<compile_context>
chip_gen: v5e
topology: v5e:2x2
jax: 0.10.0
libtpu: 0.0.40
codegen_flags: <defaults>
</compile_context>

<pallas_src>
import functools
import math

import jax
import jax.numpy as jnp
from jax.experimental import pallas as pl
from jax.experimental.pallas import tpu as pltpu


_SQRT_2_OVER_PI = math.sqrt(2.0 / math.pi)


def _gelu_tanh(x):
    # BERT-style tanh-approximate GELU (the GELU class is not defined in the spec file).
    return 0.5 * x * (1.0 + jnp.tanh(_SQRT_2_OVER_PI * (x + 0.044715 * x * x * x)))


def _layer_norm(x, gain, bias, *, eps, d):
    # torch: gain * (x - mean) / (x.std(dim=-1, unbiased=True) + eps) + bias
    mean = jnp.mean(x, axis=-1, keepdims=True)
    xc = x - mean
    var = jnp.sum(xc * xc, axis=-1, keepdims=True) * (1.0 / (d - 1))
    inv = pl.reciprocal(jnp.sqrt(var) + eps, approx=False)   # approx=True if tol allows
    return gain * xc * inv + bias


def encoder_layer_kernel(mha_ref, src_ref, w1_ref, w2_ref, vec_ref, out_ref, *,
                         eps, d_model, d_ff, tb, batch):
    D, F, B = d_model, d_ff, batch

    # Packed gain/bias rows (single resident (8, max(D,F)) block).
    g1 = vec_ref[0:1, :D]
    be1 = vec_ref[1:2, :D]
    b1 = vec_ref[2:3, :F]
    b2 = vec_ref[3:4, :D]
    g2 = vec_ref[4:5, :D]
    be2 = vec_ref[5:6, :D]

    # ---- Sublayer 1: residual broadcast (torch (B,1,D)+(B,D) -> (B,B,D)) + LayerNorm.
    # mha_ref holds TB precomputed attention-output rows; src_ref is the full input.
    x1 = (mha_ref[...][:, None, :] + src_ref[...][None, :, :]).reshape(tb * B, D)
    x1 = _layer_norm(x1, g1, be1, eps=eps, d=D)                       # (TB*B, D), f32

    # ---- PointwiseFeedForwardNetwork: Linear -> GELU -> Linear (bf16 MXU, f32 acc).
    h = jnp.dot(x1.astype(jnp.bfloat16), w1_ref[...],
                preferred_element_type=jnp.float32) + b1              # (TB*B, F)
    h = _gelu_tanh(h)
    ff = jnp.dot(h.astype(jnp.bfloat16), w2_ref[...],
                 preferred_element_type=jnp.float32) + b2             # (TB*B, D)

    # ---- Sublayer 2: residual + LayerNorm.
    y = _layer_norm(ff + x1, g2, be2, eps=eps, d=D)
    out_ref[...] = y.reshape(tb, B, D)


def _pick_slab(batch, target_rows=256):
    """Largest divisor TB of batch such that the FFN LHS (TB*batch rows) ~ target_rows."""
    divisors = [d for d in range(1, batch + 1) if batch % d == 0]
    fitting = [d for d in divisors if d * batch <= target_rows]
    tb = max(fitting) if fitting else 1
    # v7x has 2 TensorCores: keep >= 2 parallel grid steps when slabs stay fat enough.
    if batch // tb < 2:
        for d in sorted((d for d in divisors if d < tb), reverse=True):
            if d * batch >= 128:
                tb = d
                break
    return tb


def transformer_encoder_layer(sources, params, heads_count, sources_mask=None, *,
                              eps=1e-6, target_rows=256):
    """sources: (B, d_model) float32.  Returns (B, B, d_model), exactly like the torch
    module does for 2-D sources (the (B,1,D)+(B,D) residual broadcasts to (B,B,D)).
    `sources_mask` is accepted for API parity; it cannot change the output because the
    softmax over a single key is identically 1 with or without masking."""
    del sources_mask
    B, D = sources.shape
    assert D % heads_count == 0
    F = params["w1"].shape[1]
    W = max(D, F)

    # Fold value_projection followed by final_projection into a single matmul
    # (context == value_projected because the attention weights are identically 1),
    # and hoist it out of the per-step body: one XLA matmul, streamed per-slab.
    w_vf = params["wv"] @ params["wf"]                            # (D, D)
    b_vf = params["bv"] @ params["wf"] + params["bf"]             # (1, D)
    mha_all = (sources @ w_vf + b_vf).astype(jnp.float32)         # (B, D)

    # Pack the six gain/bias row-vectors into one (8, W) f32 block (one DMA/tile).
    def row(v, width):
        r = v.reshape(1, -1).astype(jnp.float32)
        return jnp.pad(r, ((0, 0), (0, width - r.shape[1])))
    packed = jnp.concatenate(
        [row(params["g1"], W), row(params["be1"], W), row(params["b1"], W),
         row(params["b2"], W), row(params["g2"], W), row(params["be2"], W),
         jnp.zeros((2, W), jnp.float32)], axis=0)                 # (8, W)

    # bf16 weights: native MXU path + half the resident VMEM footprint.
    w1_bf16 = params["w1"].astype(jnp.bfloat16)                   # (D, F)
    w2_bf16 = params["w2"].astype(jnp.bfloat16)                   # (F, D)

    tb = _pick_slab(B, target_rows)
    steps = B // tb

    kernel = functools.partial(encoder_layer_kernel, eps=eps, d_model=D, d_ff=F,
                               tb=tb, batch=B)

    # Explicit VMEM budget (re-derived from the actual blocks; generous 2x margin).
    est = (B * D * 4                    # sources, resident
           + 2 * tb * D * 4             # mha slab, double-buffered
           + D * F * 2 + F * D * 2      # bf16 weights, resident
           + 8 * W * 4                  # packed gains/biases
           + 2 * tb * B * D * 4)        # output blocks, double-buffered
    vmem_limit = int(min(max(2 * est + (4 << 20), 32 << 20), 64 << 20))

    def build_and_run(single_buffer_weights):
        def resident(shape):
            kwargs = {}
            if single_buffer_weights:
                # Constant-index blocks: no double buffering needed.
                kwargs["pipeline_mode"] = pl.Buffered(1)
            return pl.BlockSpec(shape, lambda i: (0, 0), **kwargs)

        return pl.pallas_call(
            kernel,
            out_shape=jax.ShapeDtypeStruct((B, B, D), jnp.float32),
            grid=(steps,),
            in_specs=[
                pl.BlockSpec((tb, D), lambda i: (i, 0)),   # mha_all slab (streamed)
                resident((B, D)),                           # sources (full, resident)
                resident((D, F)),                           # FFN W1 (bf16, resident)
                resident((F, D)),                           # FFN W2 (bf16, resident)
                resident((8, W)),                           # packed gains/biases
            ],
            out_specs=pl.BlockSpec((tb, B, D), lambda i: (i, 0, 0)),
            compiler_params=pltpu.CompilerParams(
                dimension_semantics=("parallel",),
                vmem_limit_bytes=vmem_limit),
        )(mha_all, sources, w1_bf16, w2_bf16, packed)

    try:
        return build_and_run(True)
    except Exception:
        # Fallback for JAX builds without BlockSpec pipeline_mode / Buffered(1).
        return build_and_run(False)


def _reference(sources, params, heads_count, *, eps=1e-6):
    """Pure-JAX f32 mirror of the full (un-simplified) torch forward, eval mode."""
    B, D = sources.shape
    d_head = D // heads_count
    qp = sources @ params["wq"] + params["bq"][0]
    kp = sources @ params["wk"] + params["bk"][0]
    vp = sources @ params["wv"] + params["bv"][0]
    qh = qp.reshape(B, 1, heads_count, d_head).transpose(0, 2, 1, 3)
    kh = kp.reshape(B, 1, heads_count, d_head).transpose(0, 2, 1, 3)
    vh = vp.reshape(B, 1, heads_count, d_head).transpose(0, 2, 1, 3)
    scores = jnp.einsum("bhqd,bhkd->bhqk", qh, kh) / math.sqrt(d_head)
    attn = jax.nn.softmax(scores, axis=3)          # softmax over a single key -> ones
    ctx = jnp.einsum("bhqk,bhkd->bhqd", attn, vh)
    ctx = ctx.transpose(0, 2, 1, 3).reshape(B, 1, D)
    mha_out = ctx @ params["wf"] + params["bf"][0]                     # (B, 1, D)

    def ln(x, gain, bias):
        mean = x.mean(axis=-1, keepdims=True)
        std = jnp.std(x, axis=-1, keepdims=True, ddof=1)
        return gain * (x - mean) / (std + eps) + bias

    x1 = ln(mha_out + sources, params["g1"][0], params["be1"][0])      # -> (B,B,D)
    h = _gelu_tanh(x1 @ params["w1"] + params["b1"][0])
    ff = h @ params["w2"] + params["b2"][0]
    return ln(ff + x1, params["g2"][0], params["be2"][0])


if __name__ == "__main__":
    # Small but lane-aligned sizes: batch=2, d_model=128 (heads=4, d_head=32), d_ff=256.
    B, D, H, F = 2, 128, 4, 256
    dropout_prob = 0.1             # identity at eval time

    key0 = jax.random.PRNGKey(0)
    ks = jax.random.split(key0, 17)
    sw = 1.0 / math.sqrt(D)
    sf = 1.0 / math.sqrt(F)

    params = {
        # MHA projections, stored as (d_in, d_out); biases as (1, d_out).  wq/bq/wk/bk
        # exist on the torch module but cannot influence the forward output; they are
        # kept only so the reference can exercise the full un-simplified path.
        "wq": jax.random.normal(ks[0], (D, D), jnp.float32) * sw,
        "bq": jax.random.normal(ks[1], (1, D), jnp.float32) * 0.01,
        "wk": jax.random.normal(ks[2], (D, D), jnp.float32) * sw,
        "bk": jax.random.normal(ks[3], (1, D), jnp.float32) * 0.01,
        "wv": jax.random.normal(ks[4], (D, D), jnp.float32) * sw,
        "bv": jax.random.normal(ks[5], (1, D), jnp.float32) * 0.01,
        "wf": jax.random.normal(ks[6], (D, D), jnp.float32) * sw,
        "bf": jax.random.normal(ks[7], (1, D), jnp.float32) * 0.01,
        # Sublayer 1 LayerNormalization
        "g1":  1.0 + 0.1 * jax.random.normal(ks[8], (1, D), jnp.float32),
        "be1": 0.01 * jax.random.normal(ks[9], (1, D), jnp.float32),
        # PointwiseFeedForwardNetwork
        "w1": jax.random.normal(ks[10], (D, F), jnp.float32) * sw,
        "b1": jax.random.normal(ks[11], (1, F), jnp.float32) * 0.01,
        "w2": jax.random.normal(ks[12], (F, D), jnp.float32) * sf,
        "b2": jax.random.normal(ks[13], (1, D), jnp.float32) * 0.01,
        # Sublayer 2 LayerNormalization
        "g2":  1.0 + 0.1 * jax.random.normal(ks[14], (1, D), jnp.float32),
        "be2": 0.01 * jax.random.normal(ks[15], (1, D), jnp.float32),
    }

    sources = jax.random.normal(ks[16], (B, D), jnp.float32)

    out = transformer_encoder_layer(sources, params, H, sources_mask=None)
    out = jax.block_until_ready(out)

    ref = _reference(sources, params, H)
    assert out.shape == (B, B, D), out.shape
    # Tolerance loosened vs. the pure-f32 reference because the FFN matmul operands
    # are bf16 in the kernel (f32 accumulation); structure/semantics stay exact.
    max_err = float(jnp.max(jnp.abs(out - ref)))
    assert jnp.allclose(out, ref, atol=5e-2, rtol=5e-2), \
        f"mismatch vs reference (max abs err {max_err:e})"

    print("KERNEL_OK")
</pallas_src>

<mosaic_0001>
module attributes {stable_mosaic.version = 11 : i64} {
  func.func @encoder_layer_kernel(%arg0: i32, %arg1: memref<2x128xf32, #tpu.memory_space<vmem>>, %arg2: memref<2x128xf32, #tpu.memory_space<vmem>>, %arg3: memref<128x256xbf16, #tpu.memory_space<vmem>>, %arg4: memref<256x128xbf16, #tpu.memory_space<vmem>>, %arg5: memref<8x256xf32, #tpu.memory_space<vmem>>, %arg6: memref<2x2x128xf32, #tpu.memory_space<vmem>>) attributes {dimension_semantics = [#tpu.dimension_semantics<parallel>], iteration_bounds = array<i64: 1>, scalar_prefetch = 0 : i64, scratch_operands = 0 : i64, tpu.core_type = #tpu.core_type<tc>, window_params = [{transform_indices = @transform_0, window_bounds = array<i64: 2, 128>}, {pipeline_mode = #tpu.pipeline_mode<synchronous>, transform_indices = @transform_1, window_bounds = array<i64: 2, 128>}, {pipeline_mode = #tpu.pipeline_mode<synchronous>, transform_indices = @transform_2, window_bounds = array<i64: 128, 256>}, {pipeline_mode = #tpu.pipeline_mode<synchronous>, transform_indices = @transform_3, window_bounds = array<i64: 256, 128>}, {pipeline_mode = #tpu.pipeline_mode<synchronous>, transform_indices = @transform_4, window_bounds = array<i64: 8, 256>}, {transform_indices = @transform_5, window_bounds = array<i64: 2, 2, 128>}]} {
    %c0 = arith.constant 0 : index
    %c0_0 = arith.constant 0 : index
    %0 = vector.load %arg5[%c0, %c0_0] : memref<8x256xf32, #tpu.memory_space<vmem>>, vector<1x128xf32>
    %c1 = arith.constant 1 : index
    %c0_1 = arith.constant 0 : index
    %1 = vector.load %arg5[%c1, %c0_1] : memref<8x256xf32, #tpu.memory_space<vmem>>, vector<1x128xf32>
    %c2 = arith.constant 2 : index
    %c0_2 = arith.constant 0 : index
    %2 = vector.load %arg5[%c2, %c0_2] : memref<8x256xf32, #tpu.memory_space<vmem>>, vector<1x256xf32>
    %c3 = arith.constant 3 : index
    %c0_3 = arith.constant 0 : index
    %3 = vector.load %arg5[%c3, %c0_3] : memref<8x256xf32, #tpu.memory_space<vmem>>, vector<1x128xf32>
    %c4 = arith.constant 4 : index
    %c0_4 = arith.constant 0 : index
    %4 = vector.load %arg5[%c4, %c0_4] : memref<8x256xf32, #tpu.memory_space<vmem>>, vector<1x128xf32>
    %c5 = arith.constant 5 : index
    %c0_5 = arith.constant 0 : index
    %5 = vector.load %arg5[%c5, %c0_5] : memref<8x256xf32, #tpu.memory_space<vmem>>, vector<1x128xf32>
    %c0_6 = arith.constant 0 : index
    %c0_7 = arith.constant 0 : index
    %6 = vector.load %arg1[%c0_6, %c0_7] : memref<2x128xf32, #tpu.memory_space<vmem>>, vector<2x128xf32>
    %7 = vector.shape_cast %6 : vector<2x128xf32> to vector<2x1x128xf32>
    %c0_8 = arith.constant 0 : index
    %c0_9 = arith.constant 0 : index
    %8 = vector.load %arg2[%c0_8, %c0_9] : memref<2x128xf32, #tpu.memory_space<vmem>>, vector<2x128xf32>
    %9 = vector.shape_cast %8 : vector<2x128xf32> to vector<1x2x128xf32>
    %10 = vector.broadcast %7 : vector<2x1x128xf32> to vector<2x2x128xf32>
    %11 = vector.broadcast %9 : vector<1x2x128xf32> to vector<2x2x128xf32>
    %12 = arith.addf %10, %11 : vector<2x2x128xf32>
    %13 = vector.shape_cast %12 : vector<2x2x128xf32> to vector<4x128xf32>
    %cst = arith.constant dense<0.000000e+00> : vector<4xf32>
    %14 = vector.multi_reduction <add>, %13, %cst [1] : vector<4x128xf32> to vector<4xf32>
    %15 = vector.shape_cast %14 : vector<4xf32> to vector<4x1xf32>
    %cst_10 = arith.constant 1.280000e+02 : f32
    %16 = vector.broadcast %cst_10 : f32 to vector<4x1xf32>
    %17 = arith.divf %15, %16 : vector<4x1xf32>
    %18 = vector.broadcast %17 : vector<4x1xf32> to vector<4x128xf32>
    %19 = arith.subf %13, %18 : vector<4x128xf32>
    %20 = arith.mulf %19, %19 : vector<4x128xf32>
    %cst_11 = arith.constant dense<0.000000e+00> : vector<4xf32>
    %21 = vector.multi_reduction <add>, %20, %cst_11 [1] : vector<4x128xf32> to vector<4xf32>
    %22 = vector.shape_cast %21 : vector<4xf32> to vector<4x1xf32>
    %cst_12 = arith.constant 0.00787401571 : f32
    %23 = vector.broadcast %cst_12 : f32 to vector<4x1xf32>
    %24 = arith.mulf %22, %23 : vector<4x1xf32>
    %25 = math.sqrt %24 : vector<4x1xf32>
    %cst_13 = arith.constant 9.99999997E-7 : f32
    %26 = vector.broadcast %cst_13 : f32 to vector<4x1xf32>
    %27 = arith.addf %25, %26 : vector<4x1xf32>
    %28 = tpu.reciprocal %27 : vector<4x1xf32> -> vector<4x1xf32>
    %29 = vector.broadcast %0 : vector<1x128xf32> to vector<4x128xf32>
    %30 = arith.mulf %29, %19 : vector<4x128xf32>
    %31 = vector.broadcast %28 : vector<4x1xf32> to vector<4x128xf32>
    %32 = arith.mulf %30, %31 : vector<4x128xf32>
    %33 = vector.broadcast %1 : vector<1x128xf32> to vector<4x128xf32>
    %34 = arith.addf %32, %33 : vector<4x128xf32>
    %35 = arith.truncf %34 : vector<4x128xf32> to vector<4x128xbf16>
    %c0_14 = arith.constant 0 : index
    %c0_15 = arith.constant 0 : index
    %36 = vector.load %arg3[%c0_14, %c0_15] : memref<128x256xbf16, #tpu.memory_space<vmem>>, vector<128x256xbf16>
    %cst_16 = arith.constant dense<0.000000e+00> : vector<4x256xf32>
    %37 = tpu.matmul %35, %36, %cst_16 {dimension_numbers = #tpu.dot_dimension_numbers<[1], [0], [0], [1], [0, 0, 1, 1], [], []>} : vector<4x128xbf16>, vector<128x256xbf16>, vector<4x256xf32> -> vector<4x256xf32>
    %38 = vector.broadcast %2 : vector<1x256xf32> to vector<4x256xf32>
    %39 = arith.addf %37, %38 : vector<4x256xf32>
    %cst_17 = arith.constant 5.000000e-01 : f32
    %40 = vector.broadcast %cst_17 : f32 to vector<4x256xf32>
    %41 = arith.mulf %40, %39 : vector<4x256xf32>
    %cst_18 = arith.constant 4.471500e-02 : f32
    %42 = vector.broadcast %cst_18 : f32 to vector<4x256xf32>
    %43 = arith.mulf %42, %39 : vector<4x256xf32>
    %44 = arith.mulf %43, %39 : vector<4x256xf32>
    %45 = arith.mulf %44, %39 : vector<4x256xf32>
    %46 = arith.addf %39, %45 : vector<4x256xf32>
    %cst_19 = arith.constant 0.797884583 : f32
    %47 = vector.broadcast %cst_19 : f32 to vector<4x256xf32>
    %48 = arith.mulf %47, %46 : vector<4x256xf32>
    %49 = math.tanh %48 : vector<4x256xf32>
    %cst_20 = arith.constant 1.000000e+00 : f32
    %50 = vector.broadcast %cst_20 : f32 to vector<4x256xf32>
    %51 = arith.addf %50, %49 : vector<4x256xf32>
    %52 = arith.mulf %41, %51 : vector<4x256xf32>
    %53 = arith.truncf %52 : vector<4x256xf32> to vector<4x256xbf16>
    %c0_21 = arith.constant 0 : index
    %c0_22 = arith.constant 0 : index
    %54 = vector.load %arg4[%c0_21, %c0_22] : memref<256x128xbf16, #tpu.memory_space<vmem>>, vector<256x128xbf16>
    %cst_23 = arith.constant dense<0.000000e+00> : vector<4x128xf32>
    %55 = tpu.matmul %53, %54, %cst_23 {dimension_numbers = #tpu.dot_dimension_numbers<[1], [0], [0], [1], [0, 0, 1, 1], [], []>} : vector<4x256xbf16>, vector<256x128xbf16>, vector<4x128xf32> -> vector<4x128xf32>
    %56 = vector.broadcast %3 : vector<1x128xf32> to vector<4x128xf32>
    %57 = arith.addf %55, %56 : vector<4x128xf32>
    %58 = arith.addf %57, %34 : vector<4x128xf32>
    %cst_24 = arith.constant dense<0.000000e+00> : vector<4xf32>
    %59 = vector.multi_reduction <add>, %58, %cst_24 [1] : vector<4x128xf32> to vector<4xf32>
    %60 = vector.shape_cast %59 : vector<4xf32> to vector<4x1xf32>
    %cst_25 = arith.constant 1.280000e+02 : f32
    %61 = vector.broadcast %cst_25 : f32 to vector<4x1xf32>
    %62 = arith.divf %60, %61 : vector<4x1xf32>
    %63 = vector.broadcast %62 : vector<4x1xf32> to vector<4x128xf32>
    %64 = arith.subf %58, %63 : vector<4x128xf32>
    %65 = arith.mulf %64, %64 : vector<4x128xf32>
    %cst_26 = arith.constant dense<0.000000e+00> : vector<4xf32>
    %66 = vector.multi_reduction <add>, %65, %cst_26 [1] : vector<4x128xf32> to vector<4xf32>
    %67 = vector.shape_cast %66 : vector<4xf32> to vector<4x1xf32>
    %cst_27 = arith.constant 0.00787401571 : f32
    %68 = vector.broadcast %cst_27 : f32 to vector<4x1xf32>
    %69 = arith.mulf %67, %68 : vector<4x1xf32>
    %70 = math.sqrt %69 : vector<4x1xf32>
    %cst_28 = arith.constant 9.99999997E-7 : f32
    %71 = vector.broadcast %cst_28 : f32 to vector<4x1xf32>
    %72 = arith.addf %70, %71 : vector<4x1xf32>
    %73 = tpu.reciprocal %72 : vector<4x1xf32> -> vector<4x1xf32>
    %74 = vector.broadcast %4 : vector<1x128xf32> to vector<4x128xf32>
    %75 = arith.mulf %74, %64 : vector<4x128xf32>
    %76 = vector.broadcast %73 : vector<4x1xf32> to vector<4x128xf32>
    %77 = arith.mulf %75, %76 : vector<4x128xf32>
    %78 = vector.broadcast %5 : vector<1x128xf32> to vector<4x128xf32>
    %79 = arith.addf %77, %78 : vector<4x128xf32>
    %80 = vector.shape_cast %79 : vector<4x128xf32> to vector<2x2x128xf32>
    %c0_29 = arith.constant 0 : index
    %c0_30 = arith.constant 0 : index
    %c0_31 = arith.constant 0 : index
    %81 = vector.load %arg6[%c0_29, %c0_30, %c0_31] : memref<2x2x128xf32, #tpu.memory_space<vmem>>, vector<2x2x128xf32>
    tpu.vector_store %arg6[%c0_29, %c0_30, %c0_31], %80 {strides = array<i32>} : memref<2x2x128xf32, #tpu.memory_space<vmem>>, vector<2x2x128xf32>,
    return
  }
  func.func @transform_0(%arg0: i32) -> (i32, i32) {
    %c0_i32 = arith.constant 0 : i32
    %c0_i32_0 = arith.constant 0 : i32
    return %arg0, %c0_i32 : i32, i32
  }
  func.func @transform_1(%arg0: i32) -> (i32, i32) {
    %c0_i32 = arith.constant 0 : i32
    %c0_i32_0 = arith.constant 0 : i32
    %c0_i32_1 = arith.constant 0 : i32
    return %c0_i32, %c0_i32_0 : i32, i32
  }
  func.func @transform_2(%arg0: i32) -> (i32, i32) {
    %c0_i32 = arith.constant 0 : i32
    %c0_i32_0 = arith.constant 0 : i32
    %c0_i32_1 = arith.constant 0 : i32
    return %c0_i32, %c0_i32_0 : i32, i32
  }
  func.func @transform_3(%arg0: i32) -> (i32, i32) {
    %c0_i32 = arith.constant 0 : i32
    %c0_i32_0 = arith.constant 0 : i32
    %c0_i32_1 = arith.constant 0 : i32
    return %c0_i32, %c0_i32_0 : i32, i32
  }
  func.func @transform_4(%arg0: i32) -> (i32, i32) {
    %c0_i32 = arith.constant 0 : i32
    %c0_i32_0 = arith.constant 0 : i32
    %c0_i32_1 = arith.constant 0 : i32
    return %c0_i32, %c0_i32_0 : i32, i32
  }
  func.func @transform_5(%arg0: i32) -> (i32, i32, i32) {
    %c0_i32 = arith.constant 0 : i32
    %c0_i32_0 = arith.constant 0 : i32
    %c0_i32_1 = arith.constant 0 : i32
    return %arg0, %c0_i32, %c0_i32_0 : i32, i32, i32
  }
}

module attributes {stable_mosaic.version = 11 : i64} {
  func.func @encoder_layer_kernel(%arg0: i32, %arg1: memref<2x128xf32, #tpu.memory_space<vmem>>, %arg2: memref<2x128xf32, #tpu.memory_space<vmem>>, %arg3: memref<128x256xbf16, #tpu.memory_space<vmem>>, %arg4: memref<256x128xbf16, #tpu.memory_space<vmem>>, %arg5: memref<8x256xf32, #tpu.memory_space<vmem>>, %arg6: memref<2x2x128xf32, #tpu.memory_space<vmem>>) attributes {dimension_semantics = [#tpu.dimension_semantics<parallel>], iteration_bounds = array<i64: 1>, scalar_prefetch = 0 : i64, scratch_operands = 0 : i64, tpu.core_type = #tpu.core_type<tc>, window_params = [{transform_indices = @transform_0, window_bounds = array<i64: 2, 128>}, {pipeline_mode = #tpu.pipeline_mode<synchronous>, transform_indices = @transform_1, window_bounds = array<i64: 2, 128>}, {pipeline_mode = #tpu.pipeline_mode<synchronous>, transform_indices = @transform_2, window_bounds = array<i64: 128, 256>}, {pipeline_mode = #tpu.pipeline_mode<synchronous>, transform_indices = @transform_3, window_bounds = array<i64: 256, 128>}, {pipeline_mode = #tpu.pipeline_mode<synchronous>, transform_indices = @transform_4, window_bounds = array<i64: 8, 256>}, {transform_indices = @transform_5, window_bounds = array<i64: 2, 2, 128>}]} {
    %c0 = arith.constant 0 : index
    %c0_0 = arith.constant 0 : index
    %0 = vector.load %arg5[%c0, %c0_0] : memref<8x256xf32, #tpu.memory_space<vmem>>, vector<1x128xf32>
    %c1 = arith.constant 1 : index
    %c0_1 = arith.constant 0 : index
    %1 = vector.load %arg5[%c1, %c0_1] : memref<8x256xf32, #tpu.memory_space<vmem>>, vector<1x128xf32>
    %c2 = arith.constant 2 : index
    %c0_2 = arith.constant 0 : index
    %2 = vector.load %arg5[%c2, %c0_2] : memref<8x256xf32, #tpu.memory_space<vmem>>, vector<1x256xf32>
    %c3 = arith.constant 3 : index
    %c0_3 = arith.constant 0 : index
    %3 = vector.load %arg5[%c3, %c0_3] : memref<8x256xf32, #tpu.memory_space<vmem>>, vector<1x128xf32>
    %c4 = arith.constant 4 : index
    %c0_4 = arith.constant 0 : index
    %4 = vector.load %arg5[%c4, %c0_4] : memref<8x256xf32, #tpu.memory_space<vmem>>, vector<1x128xf32>
    %c5 = arith.constant 5 : index
    %c0_5 = arith.constant 0 : index
    %5 = vector.load %arg5[%c5, %c0_5] : memref<8x256xf32, #tpu.memory_space<vmem>>, vector<1x128xf32>
    %c0_6 = arith.constant 0 : index
    %c0_7 = arith.constant 0 : index
    %6 = vector.load %arg1[%c0_6, %c0_7] : memref<2x128xf32, #tpu.memory_space<vmem>>, vector<2x128xf32>
    %7 = vector.shape_cast %6 : vector<2x128xf32> to vector<2x1x128xf32>
    %c0_8 = arith.constant 0 : index
    %c0_9 = arith.constant 0 : index
    %8 = vector.load %arg2[%c0_8, %c0_9] : memref<2x128xf32, #tpu.memory_space<vmem>>, vector<2x128xf32>
    %9 = vector.shape_cast %8 : vector<2x128xf32> to vector<1x2x128xf32>
    %10 = vector.broadcast %7 : vector<2x1x128xf32> to vector<2x2x128xf32>
    %11 = vector.broadcast %9 : vector<1x2x128xf32> to vector<2x2x128xf32>
    %12 = arith.addf %10, %11 : vector<2x2x128xf32>
    %13 = vector.shape_cast %12 : vector<2x2x128xf32> to vector<4x128xf32>
    %cst = arith.constant dense<0.000000e+00> : vector<4xf32>
    %14 = vector.multi_reduction <add>, %13, %cst [1] : vector<4x128xf32> to vector<4xf32>
    %15 = vector.shape_cast %14 : vector<4xf32> to vector<4x1xf32>
    %cst_10 = arith.constant 1.280000e+02 : f32
    %16 = vector.broadcast %cst_10 : f32 to vector<4x1xf32>
    %17 = arith.divf %15, %16 : vector<4x1xf32>
    %18 = vector.broadcast %17 : vector<4x1xf32> to vector<4x128xf32>
    %19 = arith.subf %13, %18 : vector<4x128xf32>
    %20 = arith.mulf %19, %19 : vector<4x128xf32>
    %cst_11 = arith.constant dense<0.000000e+00> : vector<4xf32>
    %21 = vector.multi_reduction <add>, %20, %cst_11 [1] : vector<4x128xf32> to vector<4xf32>
    %22 = vector.shape_cast %21 : vector<4xf32> to vector<4x1xf32>
    %cst_12 = arith.constant 0.00787401571 : f32
    %23 = vector.broadcast %cst_12 : f32 to vector<4x1xf32>
    %24 = arith.mulf %22, %23 : vector<4x1xf32>
    %25 = math.sqrt %24 : vector<4x1xf32>
    %cst_13 = arith.constant 9.99999997E-7 : f32
    %26 = vector.broadcast %cst_13 : f32 to vector<4x1xf32>
    %27 = arith.addf %25, %26 : vector<4x1xf32>
    %28 = tpu.reciprocal %27 : vector<4x1xf32> -> vector<4x1xf32>
    %29 = vector.broadcast %0 : vector<1x128xf32> to vector<4x128xf32>
    %30 = arith.mulf %29, %19 : vector<4x128xf32>
    %31 = vector.broadcast %28 : vector<4x1xf32> to vector<4x128xf32>
    %32 = arith.mulf %30, %31 : vector<4x128xf32>
    %33 = vector.broadcast %1 : vector<1x128xf32> to vector<4x128xf32>
    %34 = arith.addf %32, %33 : vector<4x128xf32>
    %35 = arith.truncf %34 : vector<4x128xf32> to vector<4x128xbf16>
    %c0_14 = arith.constant 0 : index
    %c0_15 = arith.constant 0 : index
    %36 = vector.load %arg3[%c0_14, %c0_15] : memref<128x256xbf16, #tpu.memory_space<vmem>>, vector<128x256xbf16>
    %cst_16 = arith.constant dense<0.000000e+00> : vector<4x256xf32>
    %37 = tpu.matmul %35, %36, %cst_16 {dimension_numbers = #tpu.dot_dimension_numbers<[1], [0], [0], [1], [0, 0, 1, 1], [], []>} : vector<4x128xbf16>, vector<128x256xbf16>, vector<4x256xf32> -> vector<4x256xf32>
    %38 = vector.broadcast %2 : vector<1x256xf32> to vector<4x256xf32>
    %39 = arith.addf %37, %38 : vector<4x256xf32>
    %cst_17 = arith.constant 5.000000e-01 : f32
    %40 = vector.broadcast %cst_17 : f32 to vector<4x256xf32>
    %41 = arith.mulf %40, %39 : vector<4x256xf32>
    %cst_18 = arith.constant 4.471500e-02 : f32
    %42 = vector.broadcast %cst_18 : f32 to vector<4x256xf32>
    %43 = arith.mulf %42, %39 : vector<4x256xf32>
    %44 = arith.mulf %43, %39 : vector<4x256xf32>
    %45 = arith.mulf %44, %39 : vector<4x256xf32>
    %46 = arith.addf %39, %45 : vector<4x256xf32>
    %cst_19 = arith.constant 0.797884583 : f32
    %47 = vector.broadcast %cst_19 : f32 to vector<4x256xf32>
    %48 = arith.mulf %47, %46 : vector<4x256xf32>
    %49 = math.tanh %48 : vector<4x256xf32>
    %cst_20 = arith.constant 1.000000e+00 : f32
    %50 = vector.broadcast %cst_20 : f32 to vector<4x256xf32>
    %51 = arith.addf %50, %49 : vector<4x256xf32>
    %52 = arith.mulf %41, %51 : vector<4x256xf32>
    %53 = arith.truncf %52 : vector<4x256xf32> to vector<4x256xbf16>
    %c0_21 = arith.constant 0 : index
    %c0_22 = arith.constant 0 : index
    %54 = vector.load %arg4[%c0_21, %c0_22] : memref<256x128xbf16, #tpu.memory_space<vmem>>, vector<256x128xbf16>
    %cst_23 = arith.constant dense<0.000000e+00> : vector<4x128xf32>
    %55 = tpu.matmul %53, %54, %cst_23 {dimension_numbers = #tpu.dot_dimension_numbers<[1], [0], [0], [1], [0, 0, 1, 1], [], []>} : vector<4x256xbf16>, vector<256x128xbf16>, vector<4x128xf32> -> vector<4x128xf32>
    %56 = vector.broadcast %3 : vector<1x128xf32> to vector<4x128xf32>
    %57 = arith.addf %55, %56 : vector<4x128xf32>
    %58 = arith.addf %57, %34 : vector<4x128xf32>
    %cst_24 = arith.constant dense<0.000000e+00> : vector<4xf32>
    %59 = vector.multi_reduction <add>, %58, %cst_24 [1] : vector<4x128xf32> to vector<4xf32>
    %60 = vector.shape_cast %59 : vector<4xf32> to vector<4x1xf32>
    %cst_25 = arith.constant 1.280000e+02 : f32
    %61 = vector.broadcast %cst_25 : f32 to vector<4x1xf32>
    %62 = arith.divf %60, %61 : vector<4x1xf32>
    %63 = vector.broadcast %62 : vector<4x1xf32> to vector<4x128xf32>
    %64 = arith.subf %58, %63 : vector<4x128xf32>
    %65 = arith.mulf %64, %64 : vector<4x128xf32>
    %cst_26 = arith.constant dense<0.000000e+00> : vector<4xf32>
    %66 = vector.multi_reduction <add>, %65, %cst_26 [1] : vector<4x128xf32> to vector<4xf32>
    %67 = vector.shape_cast %66 : vector<4xf32> to vector<4x1xf32>
    %cst_27 = arith.constant 0.00787401571 : f32
    %68 = vector.broadcast %cst_27 : f32 to vector<4x1xf32>
    %69 = arith.mulf %67, %68 : vector<4x1xf32>
    %70 = math.sqrt %69 : vector<4x1xf32>
    %cst_28 = arith.constant 9.99999997E-7 : f32
    %71 = vector.broadcast %cst_28 : f32 to vector<4x1xf32>
    %72 = arith.addf %70, %71 : vector<4x1xf32>
    %73 = tpu.reciprocal %72 : vector<4x1xf32> -> vector<4x1xf32>
    %74 = vector.broadcast %4 : vector<1x128xf32> to vector<4x128xf32>
    %75 = arith.mulf %74, %64 : vector<4x128xf32>
    %76 = vector.broadcast %73 : vector<4x1xf32> to vector<4x128xf32>
    %77 = arith.mulf %75, %76 : vector<4x128xf32>
    %78 = vector.broadcast %5 : vector<1x128xf32> to vector<4x128xf32>
    %79 = arith.addf %77, %78 : vector<4x128xf32>
    %80 = vector.shape_cast %79 : vector<4x128xf32> to vector<2x2x128xf32>
    %c0_29 = arith.constant 0 : index
    %c0_30 = arith.constant 0 : index
    %c0_31 = arith.constant 0 : index
    %81 = vector.load %arg6[%c0_29, %c0_30, %c0_31] : memref<2x2x128xf32, #tpu.memory_space<vmem>>, vector<2x2x128xf32>
    tpu.vector_store %arg6[%c0_29, %c0_30, %c0_31], %80 {strides = array<i32>} : memref<2x2x128xf32, #tpu.memory_space<vmem>>, vector<2x2x128xf32>,
    return
  }
  func.func @transform_0(%arg0: i32) -> (i32, i32) {
    %c0_i32 = arith.constant 0 : i32
    %c0_i32_0 = arith.constant 0 : i32
    return %arg0, %c0_i32 : i32, i32
  }
  func.func @transform_1(%arg0: i32) -> (i32, i32) {
    %c0_i32 = arith.constant 0 : i32
    %c0_i32_0 = arith.constant 0 : i32
    %c0_i32_1 = arith.constant 0 : i32
    return %c0_i32, %c0_i32_0 : i32, i32
  }
  func.func @transform_2(%arg0: i32) -> (i32, i32) {
    %c0_i32 = arith.constant 0 : i32
    %c0_i32_0 = arith.constant 0 : i32
    %c0_i32_1 = arith.constant 0 : i32
    return %c0_i32, %c0_i32_0 : i32, i32
  }
  func.func @transform_3(%arg0: i32) -> (i32, i32) {
    %c0_i32 = arith.constant 0 : i32
    %c0_i32_0 = arith.constant 0 : i32
    %c0_i32_1 = arith.constant 0 : i32
    return %c0_i32, %c0_i32_0 : i32, i32
  }
  func.func @transform_4(%arg0: i32) -> (i32, i32) {
    %c0_i32 = arith.constant 0 : i32
    %c0_i32_0 = arith.constant 0 : i32
    %c0_i32_1 = arith.constant 0 : i32
    return %c0_i32, %c0_i32_0 : i32, i32
  }
  func.func @transform_5(%arg0: i32) -> (i32, i32, i32) {
    %c0_i32 = arith.constant 0 : i32
    %c0_i32_0 = arith.constant 0 : i32
    %c0_i32_1 = arith.constant 0 : i32
    return %arg0, %c0_i32, %c0_i32_0 : i32, i32, i32
  }
}

</mosaic_0001>

<bundles_post_ra>
// kernel: tpu_custom_call.1
= control target key start
LH: loop header
LB: loop body
LE: loop exit
PB: predicated region body
PF: predicated region fallthrough
CT: control target
= control target key end

     0   :  { %10 = vsyncpa [#allocation3], 0  ;;  %s978_s0 = inlined_call_operand.hbm [shape: f32[2,128], index: 0, kind: input, shape index: {}]   ;;  %s979_s1 = inlined_call_operand.hbm [shape: f32[2,128], index: 1, kind: input, shape index: {}]   ;;  %s980_s2 = inlined_call_operand.hbm [shape: bf16[128,256], index: 2, kind: input, shape index: {}]   ;;  %s981_s3 = inlined_call_operand.hbm [shape: bf16[256,128], index: 3, kind: input, shape index: {}]   ;;  %s982_s4 = inlined_call_operand.hbm [shape: f32[8,256], index: 4, kind: input, shape index: {}]   ;;  %s983_s5 = inlined_call_operand.hbm [shape: f32[2,2,128], index: 5, kind: output, shape index: {}]  }
   0x1   :  { %11 = vsyncpa [#allocation6], 0 }
   0x2   :  { %12 = vsyncpa [#allocation9], 0  ;;  %s30_s20 = sshll.u32 %s979_s1, 4  ;;  %s31_s20 = int_to_ptr.hbm [resolvable:$true] %s30_s20 }
   0x3   :  { %13 = vsyncpa [#allocation4], 0  ;;  %s902_s21 = smov [#allocation5]   ;;  %s53_s25 = sshll.u32 %s981_s3, 4  ;;  %s54_s25 = int_to_ptr.hbm [resolvable:$true] %s53_s25 }
   0x4   :  { %s32_s22 = sshll.u32 %s902_s21, 4  ;;  %s903_s26 = smov [#allocation8]   ;;  %s33_s22 = int_to_ptr.vmem [resolvable:$true] %s32_s22 }
   0x5   :  { %35 = dma.hbm_to_vmem [thread:$0]  %s31_s20, 32, %s33_s22, [#allocation6]  }
   0x6   :  { %s55_s27 = sshll.u32 %s903_s26, 4  ;;  %s904_s28 = smov 64   ;;  %s56_s27 = int_to_ptr.vmem [resolvable:$true] %s55_s27 }
   0x7   :  { %s905_s29 = smov 4   ;;  %s19_s1 = sshll.u32 %s978_s0, 4  ;;  %s20_s1 = int_to_ptr.hbm [resolvable:$true] %s19_s1 }
   0x8   :  { %61 = dma.hbm_to_vmem [thread:$0]  %s54_s25, 2048, %s56_s27, [#allocation9], %s904_s28, %s904_s28, %s905_s29  }
   0x9   :  { %s906_s7 = smov [#allocation2]   ;;  %s40_s3 = sshll.u32 %s980_s2, 4  ;;  %s41_s3 = int_to_ptr.hbm [resolvable:$true] %s40_s3 }
   0xa   :  { %s21_s8 = sshll.u32 %s906_s7, 4  ;;  %s907_s11 = smov [#allocation7]   ;;  %s22_s8 = int_to_ptr.vmem [resolvable:$true] %s21_s8 }
   0xb   :  { %24 = dma.hbm_to_vmem [thread:$0]  %s20_s1, 32, %s22_s8, [#allocation3]  }
   0xc   :  { %s42_s12 = sshll.u32 %s907_s11, 4  ;;  %s908_s13 = smov 128   ;;  %s43_s12 = int_to_ptr.vmem [resolvable:$true] %s42_s12 }
   0xd   :  { %s909_s14 = smov 8   ;;  %s67_s0 = sshll.u32 %s982_s4, 4  ;;  %s68_s0 = int_to_ptr.hbm [resolvable:$true] %s67_s0 }
   0xe   :  { %48 = dma.hbm_to_vmem [thread:$0]  %s41_s3, 2048, %s43_s12, [#allocation6], %s908_s13, %s908_s13, %s909_s14  }
   0xf   :  { %s910_s17 = smov [#allocation10]  }
  0x10   :  { %s69_s18 = sshll.u32 %s910_s17, 4  ;;  %s70_s18 = int_to_ptr.vmem [resolvable:$true] %s69_s18 }
  0x11   :  { %72 = dma.hbm_to_vmem [thread:$0]  %s68_s0, 256, %s70_s18, [#allocation9]  }
  0x12   :  { %894 = dma.done.wait [#allocation3], 32  }
  0x13   :  { %895 = vsyncadd [#allocation3], 4294967264 }
  0x14   :  { %896 = dma.done.wait [#allocation6], 2080  }
  0x15   :  { %897 = vsyncadd [#allocation6], 4294965216 }
  0x16   :  { %898 = dma.done.wait [#allocation9], 2304  }
  0x17   :  { %899 = vsyncadd [#allocation9], 4294964992  ;;  %v100_v0 = vld [vmem:[#allocation2] sm:$0x3]  ;;  %v103_v1 = vld [vmem:[#allocation5] sm:$0x3] }
  0x18   :  { %v102_v2 = vrot.slane %v100_v0, 1  ;;  %v104_v3 = vperm.slane %v100_v0, 0  ;;  %vm117_vm0 = vcmask 1043456   ;;  %v911_v9 = vmov 128.0   ;;  %v619_v32 = vld [vmem:[#allocation7 + $0x70] sm:$0xf] }
  0x19   :  { %736 = vrcp.f32 %v911_v9  ;;  %v912_v15 = vmov 269488144   ;;  %v913_v17 = vmov 842150450   ;;  %v704_v33 = vld [vmem:[#allocation7 + $0x74] sm:$0xf0] }
  0x1a   :  { %v105_v4 = vperm.slane %v102_v2, 0  ;;  %v108_v5 = vadd.f32 %v104_v3, %v103_v1  ;;  %v131_v16 = vunpack.c.l.s4 %v912_v15  ;;  %v135_v18 = vunpack.c.l.s4 %v913_v17  ;;  %v703_v34 = vld [vmem:[#allocation7 + $0x74] sm:$0xf]  ;;  %v621_v36 = vld [vmem:[#allocation7 + $0x78] sm:$0xf0]  ;;  %s914_s2 = smov [#allocation11]  }
  0x1b   :  { %v620_v35 = vor.u32 %v704_v33, %v619_v32  ;;  %v624_v37 = vor.u32 %v703_v34, %v621_v36  ;;  %v611_v38 = vld [vmem:[#allocation7 + $0x60] sm:$0xf]  ;;  %v702_v39 = vld [vmem:[#allocation7 + $0x64] sm:$0xf0]  ;;  %v701_v40 = vld [vmem:[#allocation7 + $0x64] sm:$0xf] }
  0x1c   :  { %v109_v6 = vadd.f32 %v105_v4, %v103_v1  ;;  %112 = vst [vmem:[#allocation1] ss:$4 sm:$0xff] %v108_v5  ;;  %v132_v20 = vunpack.c.0.s8 %v131_v16  ;;  %v136_v21 = vunpack.c.0.s8 %v135_v18  ;;  %v612_v41 = vor.u32 %v702_v39, %v611_v38  ;;  %v613_v42 = vld [vmem:[#allocation7 + $0x68] sm:$0xf0]  ;;  %v603_v43 = vld [vmem:[#allocation7 + $0x50] sm:$0xf] }
  0x1d   :  { %294 = vmatpush.bf16.msra.mxu0 %v620_v35  ;;  %307 = vmatpush.bf16.msra.mxu1 %v624_v37  ;;  %v700_v44 = vld [vmem:[#allocation7 + $0x54] sm:$0xf0]  ;;  %v616_v45 = vor.u32 %v701_v40, %v613_v42  ;;  %v699_v46 = vld [vmem:[#allocation7 + $0x54] sm:$0xf]  ;;  %v605_v47 = vld [vmem:[#allocation7 + $0x58] sm:$0xf0] }
  0x1e   :  { %114 = vst [vmem:[#allocation1 + $0x1] ss:$4 sm:$0xff] %v109_v6  ;;  %v604_v48 = vor.u32 %v700_v44, %v603_v43  ;;  %v608_v49 = vor.u32 %v699_v46, %v605_v47  ;;  %v595_v50 = vld [vmem:[#allocation7 + $0x40] sm:$0xf]  ;;  %v698_v51 = vld [vmem:[#allocation7 + $0x44] sm:$0xf0] }
  0x1f   :  { %v737_v10 = vpop.eup %736  ;;  %v697_v52 = vld [vmem:[#allocation7 + $0x44] sm:$0xf]  ;;  %v597_v53 = vld [vmem:[#allocation7 + $0x48] sm:$0xf0]  ;;  %v596_v54 = vor.u32 %v698_v51, %v595_v50  ;;  %v587_v56 = vld [vmem:[#allocation7 + $0x30] sm:$0xf] }
  0x20   :  { %v122_v11 = vmul.f32 128.0, %v737_v10  ;;  %vm126_vm1 = vweird.f32 %v737_v10  ;;  %v600_v55 = vor.u32 %v697_v52, %v597_v53  ;;  %v696_v57 = vld [vmem:[#allocation7 + $0x34] sm:$0xf0]  ;;  %v695_v58 = vld [vmem:[#allocation7 + $0x34] sm:$0xf]  ;;  %v710_v51 = vld [vmem:[#allocation8 + $0x28] sm:$0xff] }
  0x21   :  { %295 = vmatpush.bf16.msra.mxu0 %v612_v41  ;;  %308 = vmatpush.bf16.msra.mxu1 %v616_v45  ;;  %v589_v59 = vld [vmem:[#allocation7 + $0x38] sm:$0xf0]  ;;  %v588_v60 = vor.u32 %v696_v57, %v587_v56  ;;  %v579_v63 = vld [vmem:[#allocation7 + $0x20] sm:$0xf]  ;;  %v694_v0 = vld [vmem:[#allocation7 + $0x24] sm:$0xf0] }
  0x22   :  { %v123_v12 = vsub.f32 1.0, %v122_v11  ;;  %v592_v62 = vor.u32 %v695_v58, %v589_v59  ;;  %v693_v2 = vld [vmem:[#allocation7 + $0x24] sm:$0xf]  ;;  %v581_v3 = vld [vmem:[#allocation7 + $0x28] sm:$0xf0]  ;;  %v580_v4 = vor.u32 %v694_v0, %v579_v63  ;;  %v716_v56 = vld [vmem:[#allocation8 + $0x58] sm:$0xff] }
  0x23   :  { %v573_v9 = vld [vmem:[#allocation7 + $0x18] sm:$0xf0]  ;;  %v689_v15 = vld [vmem:[#allocation7 + $0x4] sm:$0xf]  ;;  %v565_v16 = vld [vmem:[#allocation7 + $0x8] sm:$0xf0] }
  0x24   :  { %v124_v13 = vmul.f32 %v737_v10, %v123_v12  ;;  %v563_v12 = vld [vmem:[#allocation7] sm:$0xf]  ;;  %v718_v52 = vld [vmem:[#allocation8 + $0x68] sm:$0xff]  ;;  %v707_v57 = vld [vmem:[#allocation8 + $0x10] sm:$0xff]  ;;  %s544_s4 = sshll.u32 %s914_s2, 4  ;;  %s546_s21 = sshll.u32 %s983_s5, 4  ;;  %s545_s4 = int_to_ptr.vmem [resolvable:$true] %s544_s4  ;;  %s547_s21 = int_to_ptr.hbm [resolvable:$true] %s546_s21 }
  0x25   :  { %v115_v7 = vld.sshfl [vmem:[#allocation1] sm:$0xff pattern:$0x73625140]  ;;  %296 = vmatpush.bf16.msra.mxu0 %v604_v48  ;;  %309 = vmatpush.bf16.msra.mxu1 %v608_v49  ;;  %v93_v40 = vld [vmem:[#allocation10] ss:$0 sm:$0xff]  ;;  %v706_v59 = vld [vmem:[#allocation8 + $0x8] sm:$0xff] }
  0x26   :  { %v118_v8 = vsel %vm117_vm0, %v115_v7, 0.0  ;;  %v125_v14 = vadd.f32 %v737_v10, %v124_v13  ;;  %v692_v7 = vld [vmem:[#allocation7 + $0x14] sm:$0xf0]  ;;  %v690_v13 = vld [vmem:[#allocation7 + $0x4] sm:$0xf0]  ;;  %v709_v53 = vld [vmem:[#allocation8 + $0x20] sm:$0xff] }
  0x27   :  { %119 = vadd.xlane.f32.xlu0 %v118_v8  ;;  %v691_v8 = vld [vmem:[#allocation7 + $0x14] sm:$0xf]  ;;  %v564_v18 = vor.u32 %v690_v13, %v563_v12  ;;  %v94_v46 = vld [vmem:[#allocation10 + $0x1] ss:$0 sm:$0xff]  ;;  %s915_s22 = smov 32   ;;  %s916_s23 = smov 2  }
  0x28   :  { %v963_v19 = vsel %vm126_vm1, %v737_v10, %v125_v14  ;;  %v576_v11 = vor.u32 %v691_v8, %v573_v9  ;;  %v715_v58 = vld [vmem:[#allocation8 + $0x50] sm:$0xff]  ;;  %v96_v63 = vld [vmem:[#allocation10 + $0x2] ss:$8 sm:$0x3] }
  0x29   :  { %297 = vmatpush.bf16.msra.mxu0 %v596_v54  ;;  %310 = vmatpush.bf16.msra.mxu1 %v600_v55  ;;  %v717_v54 = vld [vmem:[#allocation8 + $0x60] sm:$0xff]  ;;  %v708_v55 = vld [vmem:[#allocation8 + $0x18] sm:$0xff]  ;;  %v210_v0 = vperm.slane %v96_v63, 0 }
  0x2d   :  { %298 = vmatpush.bf16.msra.mxu0 %v588_v60  ;;  %311 = vmatpush.bf16.msra.mxu1 %v592_v62  ;;  %v714_v60 = vld [vmem:[#allocation8 + $0x48] sm:$0xff]  ;;  %v713_v62 = vld [vmem:[#allocation8 + $0x40] sm:$0xff] }
  0x31   :  { %299 = vmatpush.bf16.msra.mxu0 %v580_v4 }
  0x9a   :  { %v120_v22 = vpop.xlane.xlu0 %119 }
  0x9b   :  { %v128_v23 = vmul.f32 %v963_v19, %v120_v22 }
  0x9d   :  { %v133_v24 = vperm.slane %v128_v23, %v132_v20  ;;  %v137_v25 = vperm.slane %v128_v23, %v136_v21  ;;  %v568_v21 = vor.u32 %v689_v15, %v565_v16 }
  0x9f   :  { %v140_v26 = vsub.f32 %v108_v5, %v133_v24  ;;  %v141_v27 = vsub.f32 %v109_v6, %v137_v25  ;;  %v584_v5 = vor.u32 %v693_v2, %v581_v3  ;;  %v571_v6 = vld [vmem:[#allocation7 + $0x10] sm:$0xf]  ;;  %v712_v24 = vld [vmem:[#allocation8 + $0x38] sm:$0xff] }
  0xa0   :  { %v572_v10 = vor.u32 %v692_v7, %v571_v6  ;;  %v720_v25 = vld [vmem:[#allocation8 + $0x78] sm:$0xff]  ;;  %468 = vmatpush.bf16.msra.mxu2 %v712_v24 }
  0xa1   :  { %v142_v28 = vmul.f32 %v140_v26, %v140_v26  ;;  %v143_v29 = vmul.f32 %v141_v27, %v141_v27  ;;  %312 = vmatpush.bf16.msra.mxu1 %v584_v5  ;;  %481 = vmatpush.bf16.msra.mxu3 %v720_v25 }
  0xa2   :  { %300 = vmatpush.bf16.msra.mxu0 %v572_v10 }
  0xa3   :  { %146 = vst [vmem:[#allocation1] ss:$4 sm:$0xff] %v142_v28  ;;  %v719_v28 = vld [vmem:[#allocation8 + $0x70] sm:$0xff] }
  0xa4   :  { %148 = vst [vmem:[#allocation1 + $0x1] ss:$4 sm:$0xff] %v143_v29 }
  0xa5   :  { %313 = vmatpush.bf16.msra.mxu1 %v576_v11  ;;  %482 = vmatpush.bf16.msra.mxu3 %v719_v28 }
  0xa6   :  { %301 = vmatpush.bf16.msra.mxu0 %v564_v18 }
  0xa9   :  { %314 = vmatpush.bf16.msra.mxu1 %v568_v21  ;;  %483 = vmatpush.bf16.msra.mxu3 %v718_v52 }
  0xab   :  { %v149_v30 = vld.sshfl [vmem:[#allocation1] sm:$0xff pattern:$0x73625140] }
  0xac   :  { %v151_v31 = vsel %vm117_vm0, %v149_v30, 0.0  ;;  %184 = vst [vmem:[#allocation1] ss:$4 sm:$0xff] %v140_v26 }
  0xad   :  { %186 = vst [vmem:[#allocation1 + $0x1] ss:$4 sm:$0xff] %v141_v27  ;;  %152 = vadd.xlane.f32.xlu0 %v151_v31  ;;  %v711_v27 = vld [vmem:[#allocation8 + $0x30] sm:$0xff]  ;;  %484 = vmatpush.bf16.msra.mxu3 %v717_v54 }
  0xae   :  { %469 = vmatpush.bf16.msra.mxu2 %v711_v27 }
  0xb1   :  { %485 = vmatpush.bf16.msra.mxu3 %v716_v56 }
  0xb2   :  { %470 = vmatpush.bf16.msra.mxu2 %v710_v51 }
  0xb4   :  { %v187_v41 = vld.sshfl [vmem:[#allocation1] sm:$0xff pattern:$0x73625140] }
  0xb5   :  { %v189_v45 = vmul.f32 %v187_v41, %v93_v40  ;;  %486 = vmatpush.bf16.msra.mxu3 %v715_v58 }
  0xb6   :  { %471 = vmatpush.bf16.msra.mxu2 %v709_v53 }
  0xb9   :  { %487 = vmatpush.bf16.msra.mxu3 %v714_v60 }
  0xba   :  { %472 = vmatpush.bf16.msra.mxu2 %v708_v55 }
  0xbd   :  { %488 = vmatpush.bf16.msra.mxu3 %v713_v62 }
  0xbe   :  { %473 = vmatpush.bf16.msra.mxu2 %v707_v57 }
  0xc2   :  { %474 = vmatpush.bf16.msra.mxu2 %v706_v59 }
 0x120   :  { %v153_v61 = vpop.xlane.xlu0 %152 }
 0x121   :  { %v154_v1 = vmul.f32 0.007874016, %v153_v61  ;;  %v705_v61 = vld [vmem:[#allocation8] sm:$0xff] }
 0x122   :  { %475 = vmatpush.bf16.msra.mxu2 %v705_v61  ;;  %v98_v61 = vld [vmem:[#allocation10 + $0x4] ss:$0 sm:$0xff] }
 0x123   :  { %738 = vrsqrt.f32 %v154_v1  ;;  %vm162_vm2 = vcmp.eq.f32.partialorder %v154_v1, inf  ;;  %v165_v30 = vand.u32 2147483648, %v154_v1  ;;  %vm164_vm3 = vcmp.eq.f32.partialorder %v154_v1, 0.0 }
 0x129   :  { %v739_v14 = vpop.eup %738 }
 0x12a   :  { %v156_v17 = vmul.f32 %v739_v14, %v154_v1 }
 0x12c   :  { %v157_v20 = vmul.f32 %v739_v14, %v156_v17 }
 0x12e   :  { %v158_v22 = vmul.f32 0.5, %v157_v20 }
 0x130   :  { %v159_v23 = vsub.f32 1.5, %v158_v22 }
 0x132   :  { %v160_v26 = vmul.f32 %v739_v14, %v159_v23 }
 0x134   :  { %v161_v29 = vmul.f32 %v160_v26, %v154_v1 }
 0x136   :  { %v163_v31 = vsel %vm162_vm2, %v154_v1, %v161_v29  ;;  %v211_v1 = vperm.slane %v96_v63, 1  ;;  %v97_v29 = vld [vmem:[#allocation10 + $0x3] ss:$0 sm:$0xff] }
 0x137   :  { %v166_v32 = vsel %vm164_vm3, %v165_v30, %v163_v31 }
 0x138   :  { %v167_v33 = vadd.f32 1e-06, %v166_v32 }
 0x13a   :  { %740 = vrcp.f32 %v167_v33  ;;  %v179_v37 = vand.u32 2147483648, %v167_v33  ;;  %v177_v39 = vand.u32 2147483647, %v167_v33  ;;  %vm173_vm5 = vweird.f32 %v167_v33 }
 0x13c   :  { %v180_v43 = vor.u32 1.1754944e-38, %v179_v37  ;;  %vm178_vm7 = vcmp.eq.f32.partialorder %v177_v39, 8.507059e+37 }
 0x140   :  { %v741_v34 = vpop.eup %740 }
 0x141   :  { %v169_v35 = vmul.f32 %v741_v34, %v167_v33  ;;  %vm174_vm4 = vweird.f32 %v741_v34 }
 0x142   :  { %vm175_vm6 = vmor %vm173_vm5, %vm174_vm4 }
 0x143   :  { %v170_v36 = vsub.f32 1.0, %v169_v35 }
 0x145   :  { %v171_v38 = vmul.f32 %v741_v34, %v170_v36 }
 0x147   :  { %v172_v42 = vadd.f32 %v741_v34, %v171_v38 }
 0x149   :  { %v176_v44 = vsel %vm175_vm6, %v741_v34, %v172_v42 }
 0x14a   :  { %v181_v47 = vsel %vm178_vm7, %v180_v43, %v176_v44 }
 0x14b   :  { %v190_v48 = vmul.f32 %v189_v45, %v181_v47 }
 0x14d   :  { %v967_v49 = vadd.f32 %v190_v48, %v94_v46 }
 0x14f   :  { %v192_v50 = vpack.c.bf16 %v967_v49, %v967_v49 }
 0x151   :  { %302 = vmatmul.bf16.vlgmr.msra.gmra.mxu0 %v192_v50  ;;  %315 = vmatmul.bf16.vlgmr.msra.gmra.mxu1 %v192_v50 }
 0x1ce   :  { %v303_v2 = vpop.f32.mrf.mxu0  ;;  %v316_v3 = vpop.f32.mrf.mxu1 }
 0x1cf   :  { %v304_v4 = vadd.f32 %v303_v2, %v210_v0  ;;  %v317_v5 = vadd.f32 %v316_v3, %v211_v1  ;;  %v99_v2 = vld [vmem:[#allocation10 + $0x5] ss:$0 sm:$0xff] }
 0x1d1   :  { %v322_v6 = vmul.f32 0.044715, %v304_v4  ;;  %v323_v7 = vmul.f32 0.044715, %v317_v5  ;;  %v320_v21 = vmul.f32 0.5, %v304_v4  ;;  %v321_v23 = vmul.f32 0.5, %v317_v5 }
 0x1d3   :  { %v324_v8 = vmul.f32 %v322_v6, %v304_v4  ;;  %v325_v9 = vmul.f32 %v323_v7, %v317_v5 }
 0x1d5   :  { %v326_v10 = vmul.f32 %v324_v8, %v304_v4  ;;  %v327_v11 = vmul.f32 %v325_v9, %v317_v5 }
 0x1d6   :  { %v305_v12 = vpop.f32.mrf.mxu0  ;;  %v318_v13 = vpop.f32.mrf.mxu1 }
 0x1d7   :  { %v328_v14 = vadd.f32 %v326_v10, %v304_v4  ;;  %v329_v15 = vadd.f32 %v327_v11, %v317_v5 }
 0x1d9   :  { %v330_v16 = vmul.f32 0.7978846, %v328_v14  ;;  %v331_v17 = vmul.f32 0.7978846, %v329_v15 }
 0x1db   :  { %742 = vtanh.f32 %v330_v16 }
 0x1dc   :  { %744 = vtanh.f32 %v331_v17 }
 0x1e1   :  { %v743_v18 = vpop.eup %742 }
 0x1e2   :  { %v745_v20 = vpop.eup %744  ;;  %v334_v22 = vadd.f32 1.0, %v743_v18 }
 0x1e3   :  { %v335_v24 = vadd.f32 1.0, %v745_v20 }
 0x1e4   :  { %v336_v25 = vmul.f32 %v334_v22, %v320_v21 }
 0x1e5   :  { %v337_v26 = vmul.f32 %v335_v24, %v321_v23 }
 0x1e6   :  { %v338_v27 = vpack.c.bf16 %v336_v25, %v336_v25 }
 0x1e7   :  { %v339_v28 = vpack.c.bf16 %v337_v26, %v337_v26 }
 0x1e8   :  { %476 = vmatmul.bf16.vlgmr.msra.gmra.mxu2 %v338_v27 }
 0x1e9   :  { %489 = vmatmul.bf16.vlgmr.msra.gmra.mxu3 %v339_v28 }
 0x26b   :  { %v477_v30 = vpop.f32.mrf.mxu2 }
 0x26c   :  { %v478_v31 = vadd.f32 %v477_v30, %v97_v29  ;;  %v490_v32 = vpop.f32.mrf.mxu3 }
 0x26e   :  { %v491_v33 = vadd.f32 %v490_v32, %v478_v31 }
 0x270   :  { %v494_v34 = vadd.f32 %v491_v33, %v967_v49 }
 0x272   :  { %v495_v35 = vsel %vm117_vm0, %v494_v34, 0.0 }
 0x273   :  { %v479_v36 = vpop.f32.mrf.mxu2  ;;  %496 = vadd.xlane.f32.xlu1 %v495_v35 }
 0x274   :  { %v492_v37 = vpop.f32.mrf.mxu3 }
 0x2e6   :  { %v497_v38 = vpop.xlane.xlu1 %496 }
 0x2e7   :  { %v498_v39 = vmul.f32 %v497_v38, %v963_v19 }
 0x2e9   :  { %v499_v40 = vsub.f32 %v494_v34, %v498_v39 }
 0x2eb   :  { %v500_v41 = vmul.f32 %v499_v40, %v499_v40  ;;  %v532_v0 = vmul.f32 %v499_v40, %v98_v61 }
 0x2ed   :  { %v501_v42 = vsel %vm117_vm0, %v500_v41, 0.0 }
 0x2ee   :  { %502 = vadd.xlane.f32.xlu1 %v501_v42 }
 0x361   :  { %v503_v43 = vpop.xlane.xlu1 %502 }
 0x362   :  { %v504_v44 = vmul.f32 0.007874016, %v503_v43 }
 0x364   :  { %746 = vrsqrt.f32 %v504_v44  ;;  %vm512_vm8 = vcmp.eq.f32.partialorder %v504_v44, inf  ;;  %v515_v52 = vand.u32 2147483648, %v504_v44  ;;  %vm514_vm9 = vcmp.eq.f32.partialorder %v504_v44, 0.0 }
 0x36a   :  { %v747_v45 = vpop.eup %746 }
 0x36b   :  { %v506_v46 = vmul.f32 %v747_v45, %v504_v44 }
 0x36d   :  { %v507_v47 = vmul.f32 %v747_v45, %v506_v46 }
 0x36f   :  { %v508_v48 = vmul.f32 0.5, %v507_v47 }
 0x371   :  { %v509_v49 = vsub.f32 1.5, %v508_v48 }
 0x373   :  { %v510_v50 = vmul.f32 %v747_v45, %v509_v49 }
 0x375   :  { %v511_v51 = vmul.f32 %v510_v50, %v504_v44 }
 0x377   :  { %v513_v53 = vsel %vm512_vm8, %v504_v44, %v511_v51 }
 0x378   :  { %v516_v19 = vsel %vm514_vm9, %v515_v52, %v513_v53 }
 0x379   :  { %v517_v54 = vadd.f32 1e-06, %v516_v19 }
 0x37b   :  { %748 = vrcp.f32 %v517_v54  ;;  %v529_v58 = vand.u32 2147483648, %v517_v54  ;;  %v527_v60 = vand.u32 2147483647, %v517_v54  ;;  %vm523_vm11 = vweird.f32 %v517_v54 }
 0x37d   :  { %v530_v63 = vor.u32 1.1754944e-38, %v529_v58  ;;  %vm528_vm13 = vcmp.eq.f32.partialorder %v527_v60, 8.507059e+37 }
 0x381   :  { %v749_v55 = vpop.eup %748 }
 0x382   :  { %v519_v56 = vmul.f32 %v749_v55, %v517_v54  ;;  %vm524_vm10 = vweird.f32 %v749_v55 }
 0x383   :  { %vm525_vm12 = vmor %vm523_vm11, %vm524_vm10 }
 0x384   :  { %v520_v57 = vsub.f32 1.0, %v519_v56 }
 0x386   :  { %v521_v59 = vmul.f32 %v749_v55, %v520_v57 }
 0x388   :  { %v522_v62 = vadd.f32 %v749_v55, %v521_v59 }
 0x38a   :  { %v526_v1 = vsel %vm525_vm12, %v749_v55, %v522_v62 }
 0x38b   :  { %v531_v3 = vsel %vm528_vm13, %v530_v63, %v526_v1 }
 0x38c   :  { %v533_v4 = vmul.f32 %v532_v0, %v531_v3 }
 0x38e   :  { %v534_v5 = vadd.f32 %v533_v4, %v99_v2 }
 0x390   :  { %v536_v6 = vrot.slane %v534_v5, 2  ;;  %538 = vst [vmem:[#allocation11] sm:$0x3] %v534_v5 }
 0x392   :  { %539 = vst [vmem:[#allocation11 + $0x2] sm:$0x3] %v536_v6 }
 0x393   :  { %552 = dma.vmem_to_hbm [thread:$0]  %s545_s4, 64, %s547_s21, [#allocation4], %s915_s22, %s915_s22, %s916_s23  }
 0x394   :  { %900 = dma.done.wait [#allocation4], 64  }
 0x395   :  { %901 = vsyncadd [#allocation4], 4294967232 }
 0x396   :  { %557 = vsyncpa [#allocation3], 1 }
 0x397   :  { %558 = vsyncpa [#allocation6], 1 }
 0x398   :  { %559 = vsyncpa [#allocation9], 1 }
 0x399   :  { %560 = vsyncpa [#allocation4], 1 }

// kernel: tpu_custom_call.1
= control target key start
LH: loop header
LB: loop body
LE: loop exit
PB: predicated region body
PF: predicated region fallthrough
CT: control target
= control target key end

     0   :  { %10 = vsyncpa [#allocation3], 0  ;;  %s978_s0 = inlined_call_operand.hbm [shape: f32[2,128], index: 0, kind: input, shape index: {}]   ;;  %s979_s1 = inlined_call_operand.hbm [shape: f32[2,128], index: 1, kind: input, shape index: {}]   ;;  %s980_s2 = inlined_call_operand.hbm [shape: bf16[128,256], index: 2, kind: input, shape index: {}]   ;;  %s981_s3 = inlined_call_operand.hbm [shape: bf16[256,128], index: 3, kind: input, shape index: {}]   ;;  %s982_s4 = inlined_call_operand.hbm [shape: f32[8,256], index: 4, kind: input, shape index: {}]   ;;  %s983_s5 = inlined_call_operand.hbm [shape: f32[2,2,128], index: 5, kind: output, shape index: {}]  }
   0x1   :  { %11 = vsyncpa [#allocation6], 0 }
   0x2   :  { %12 = vsyncpa [#allocation9], 0  ;;  %s30_s20 = sshll.u32 %s979_s1, 4  ;;  %s31_s20 = int_to_ptr.hbm [resolvable:$true] %s30_s20 }
   0x3   :  { %13 = vsyncpa [#allocation4], 0  ;;  %s902_s21 = smov [#allocation5]   ;;  %s53_s25 = sshll.u32 %s981_s3, 4  ;;  %s54_s25 = int_to_ptr.hbm [resolvable:$true] %s53_s25 }
   0x4   :  { %s32_s22 = sshll.u32 %s902_s21, 4  ;;  %s903_s26 = smov [#allocation8]   ;;  %s33_s22 = int_to_ptr.vmem [resolvable:$true] %s32_s22 }
   0x5   :  { %35 = dma.hbm_to_vmem [thread:$0]  %s31_s20, 32, %s33_s22, [#allocation6]  }
   0x6   :  { %s55_s27 = sshll.u32 %s903_s26, 4  ;;  %s904_s28 = smov 64   ;;  %s56_s27 = int_to_ptr.vmem [resolvable:$true] %s55_s27 }
   0x7   :  { %s905_s29 = smov 4   ;;  %s19_s1 = sshll.u32 %s978_s0, 4  ;;  %s20_s1 = int_to_ptr.hbm [resolvable:$true] %s19_s1 }
   0x8   :  { %61 = dma.hbm_to_vmem [thread:$0]  %s54_s25, 2048, %s56_s27, [#allocation9], %s904_s28, %s904_s28, %s905_s29  }
   0x9   :  { %s906_s7 = smov [#allocation2]   ;;  %s40_s3 = sshll.u32 %s980_s2, 4  ;;  %s41_s3 = int_to_ptr.hbm [resolvable:$true] %s40_s3 }
   0xa   :  { %s21_s8 = sshll.u32 %s906_s7, 4  ;;  %s907_s11 = smov [#allocation7]   ;;  %s22_s8 = int_to_ptr.vmem [resolvable:$true] %s21_s8 }
   0xb   :  { %24 = dma.hbm_to_vmem [thread:$0]  %s20_s1, 32, %s22_s8, [#allocation3]  }
   0xc   :  { %s42_s12 = sshll.u32 %s907_s11, 4  ;;  %s908_s13 = smov 128   ;;  %s43_s12 = int_to_ptr.vmem [resolvable:$true] %s42_s12 }
   0xd   :  { %s909_s14 = smov 8   ;;  %s67_s0 = sshll.u32 %s982_s4, 4  ;;  %s68_s0 = int_to_ptr.hbm [resolvable:$true] %s67_s0 }
   0xe   :  { %48 = dma.hbm_to_vmem [thread:$0]  %s41_s3, 2048, %s43_s12, [#allocation6], %s908_s13, %s908_s13, %s909_s14  }
   0xf   :  { %s910_s17 = smov [#allocation10]  }
  0x10   :  { %s69_s18 = sshll.u32 %s910_s17, 4  ;;  %s70_s18 = int_to_ptr.vmem [resolvable:$true] %s69_s18 }
  0x11   :  { %72 = dma.hbm_to_vmem [thread:$0]  %s68_s0, 256, %s70_s18, [#allocation9]  }
  0x12   :  { %894 = dma.done.wait [#allocation3], 32  }
  0x13   :  { %895 = vsyncadd [#allocation3], 4294967264 }
  0x14   :  { %896 = dma.done.wait [#allocation6], 2080  }
  0x15   :  { %897 = vsyncadd [#allocation6], 4294965216 }
  0x16   :  { %898 = dma.done.wait [#allocation9], 2304  }
  0x17   :  { %899 = vsyncadd [#allocation9], 4294964992  ;;  %v100_v0 = vld [vmem:[#allocation2] sm:$0x3]  ;;  %v103_v1 = vld [vmem:[#allocation5] sm:$0x3] }
  0x18   :  { %v102_v2 = vrot.slane %v100_v0, 1  ;;  %v104_v3 = vperm.slane %v100_v0, 0  ;;  %vm117_vm0 = vcmask 1043456   ;;  %v911_v9 = vmov 128.0   ;;  %v619_v32 = vld [vmem:[#allocation7 + $0x70] sm:$0xf] }
  0x19   :  { %736 = vrcp.f32 %v911_v9  ;;  %v912_v15 = vmov 269488144   ;;  %v913_v17 = vmov 842150450   ;;  %v704_v33 = vld [vmem:[#allocation7 + $0x74] sm:$0xf0] }
  0x1a   :  { %v105_v4 = vperm.slane %v102_v2, 0  ;;  %v108_v5 = vadd.f32 %v104_v3, %v103_v1  ;;  %v131_v16 = vunpack.c.l.s4 %v912_v15  ;;  %v135_v18 = vunpack.c.l.s4 %v913_v17  ;;  %v703_v34 = vld [vmem:[#allocation7 + $0x74] sm:$0xf]  ;;  %v621_v36 = vld [vmem:[#allocation7 + $0x78] sm:$0xf0]  ;;  %s914_s2 = smov [#allocation11]  }
  0x1b   :  { %v620_v35 = vor.u32 %v704_v33, %v619_v32  ;;  %v624_v37 = vor.u32 %v703_v34, %v621_v36  ;;  %v611_v38 = vld [vmem:[#allocation7 + $0x60] sm:$0xf]  ;;  %v702_v39 = vld [vmem:[#allocation7 + $0x64] sm:$0xf0]  ;;  %v701_v40 = vld [vmem:[#allocation7 + $0x64] sm:$0xf] }
  0x1c   :  { %v109_v6 = vadd.f32 %v105_v4, %v103_v1  ;;  %112 = vst [vmem:[#allocation1] ss:$4 sm:$0xff] %v108_v5  ;;  %v132_v20 = vunpack.c.0.s8 %v131_v16  ;;  %v136_v21 = vunpack.c.0.s8 %v135_v18  ;;  %v612_v41 = vor.u32 %v702_v39, %v611_v38  ;;  %v613_v42 = vld [vmem:[#allocation7 + $0x68] sm:$0xf0]  ;;  %v603_v43 = vld [vmem:[#allocation7 + $0x50] sm:$0xf] }
  0x1d   :  { %294 = vmatpush.bf16.msra.mxu0 %v620_v35  ;;  %307 = vmatpush.bf16.msra.mxu1 %v624_v37  ;;  %v700_v44 = vld [vmem:[#allocation7 + $0x54] sm:$0xf0]  ;;  %v616_v45 = vor.u32 %v701_v40, %v613_v42  ;;  %v699_v46 = vld [vmem:[#allocation7 + $0x54] sm:$0xf]  ;;  %v605_v47 = vld [vmem:[#allocation7 + $0x58] sm:$0xf0] }
  0x1e   :  { %114 = vst [vmem:[#allocation1 + $0x1] ss:$4 sm:$0xff] %v109_v6  ;;  %v604_v48 = vor.u32 %v700_v44, %v603_v43  ;;  %v608_v49 = vor.u32 %v699_v46, %v605_v47  ;;  %v595_v50 = vld [vmem:[#allocation7 + $0x40] sm:$0xf]  ;;  %v698_v51 = vld [vmem:[#allocation7 + $0x44] sm:$0xf0] }
  0x1f   :  { %v737_v10 = vpop.eup %736  ;;  %v697_v52 = vld [vmem:[#allocation7 + $0x44] sm:$0xf]  ;;  %v597_v53 = vld [vmem:[#allocation7 + $0x48] sm:$0xf0]  ;;  %v596_v54 = vor.u32 %v698_v51, %v595_v50  ;;  %v587_v56 = vld [vmem:[#allocation7 + $0x30] sm:$0xf] }
  0x20   :  { %v122_v11 = vmul.f32 128.0, %v737_v10  ;;  %vm126_vm1 = vweird.f32 %v737_v10  ;;  %v600_v55 = vor.u32 %v697_v52, %v597_v53  ;;  %v696_v57 = vld [vmem:[#allocation7 + $0x34] sm:$0xf0]  ;;  %v695_v58 = vld [vmem:[#allocation7 + $0x34] sm:$0xf]  ;;  %v710_v51 = vld [vmem:[#allocation8 + $0x28] sm:$0xff] }
  0x21   :  { %295 = vmatpush.bf16.msra.mxu0 %v612_v41  ;;  %308 = vmatpush.bf16.msra.mxu1 %v616_v45  ;;  %v589_v59 = vld [vmem:[#allocation7 + $0x38] sm:$0xf0]  ;;  %v588_v60 = vor.u32 %v696_v57, %v587_v56  ;;  %v579_v63 = vld [vmem:[#allocation7 + $0x20] sm:$0xf]  ;;  %v694_v0 = vld [vmem:[#allocation7 + $0x24] sm:$0xf0] }
  0x22   :  { %v123_v12 = vsub.f32 1.0, %v122_v11  ;;  %v592_v62 = vor.u32 %v695_v58, %v589_v59  ;;  %v693_v2 = vld [vmem:[#allocation7 + $0x24] sm:$0xf]  ;;  %v581_v3 = vld [vmem:[#allocation7 + $0x28] sm:$0xf0]  ;;  %v580_v4 = vor.u32 %v694_v0, %v579_v63  ;;  %v716_v56 = vld [vmem:[#allocation8 + $0x58] sm:$0xff] }
  0x23   :  { %v573_v9 = vld [vmem:[#allocation7 + $0x18] sm:$0xf0]  ;;  %v689_v15 = vld [vmem:[#allocation7 + $0x4] sm:$0xf]  ;;  %v565_v16 = vld [vmem:[#allocation7 + $0x8] sm:$0xf0] }
  0x24   :  { %v124_v13 = vmul.f32 %v737_v10, %v123_v12  ;;  %v563_v12 = vld [vmem:[#allocation7] sm:$0xf]  ;;  %v718_v52 = vld [vmem:[#allocation8 + $0x68] sm:$0xff]  ;;  %v707_v57 = vld [vmem:[#allocation8 + $0x10] sm:$0xff]  ;;  %s544_s4 = sshll.u32 %s914_s2, 4  ;;  %s546_s21 = sshll.u32 %s983_s5, 4  ;;  %s545_s4 = int_to_ptr.vmem [resolvable:$true] %s544_s4  ;;  %s547_s21 = int_to_ptr.hbm [resolvable:$true] %s546_s21 }
  0x25   :  { %v115_v7 = vld.sshfl [vmem:[#allocation1] sm:$0xff pattern:$0x73625140]  ;;  %296 = vmatpush.bf16.msra.mxu0 %v604_v48  ;;  %309 = vmatpush.bf16.msra.mxu1 %v608_v49  ;;  %v93_v40 = vld [vmem:[#allocation10] ss:$0 sm:$0xff]  ;;  %v706_v59 = vld [vmem:[#allocation8 + $0x8] sm:$0xff] }
  0x26   :  { %v118_v8 = vsel %vm117_vm0, %v115_v7, 0.0  ;;  %v125_v14 = vadd.f32 %v737_v10, %v124_v13  ;;  %v692_v7 = vld [vmem:[#allocation7 + $0x14] sm:$0xf0]  ;;  %v690_v13 = vld [vmem:[#allocation7 + $0x4] sm:$0xf0]  ;;  %v709_v53 = vld [vmem:[#allocation8 + $0x20] sm:$0xff] }
  0x27   :  { %119 = vadd.xlane.f32.xlu0 %v118_v8  ;;  %v691_v8 = vld [vmem:[#allocation7 + $0x14] sm:$0xf]  ;;  %v564_v18 = vor.u32 %v690_v13, %v563_v12  ;;  %v94_v46 = vld [vmem:[#allocation10 + $0x1] ss:$0 sm:$0xff]  ;;  %s915_s22 = smov 32   ;;  %s916_s23 = smov 2  }
  0x28   :  { %v963_v19 = vsel %vm126_vm1, %v737_v10, %v125_v14  ;;  %v576_v11 = vor.u32 %v691_v8, %v573_v9  ;;  %v715_v58 = vld [vmem:[#allocation8 + $0x50] sm:$0xff]  ;;  %v96_v63 = vld [vmem:[#allocation10 + $0x2] ss:$8 sm:$0x3] }
  0x29   :  { %297 = vmatpush.bf16.msra.mxu0 %v596_v54  ;;  %310 = vmatpush.bf16.msra.mxu1 %v600_v55  ;;  %v717_v54 = vld [vmem:[#allocation8 + $0x60] sm:$0xff]  ;;  %v708_v55 = vld [vmem:[#allocation8 + $0x18] sm:$0xff]  ;;  %v210_v0 = vperm.slane %v96_v63, 0 }
  0x2d   :  { %298 = vmatpush.bf16.msra.mxu0 %v588_v60  ;;  %311 = vmatpush.bf16.msra.mxu1 %v592_v62  ;;  %v714_v60 = vld [vmem:[#allocation8 + $0x48] sm:$0xff]  ;;  %v713_v62 = vld [vmem:[#allocation8 + $0x40] sm:$0xff] }
  0x31   :  { %299 = vmatpush.bf16.msra.mxu0 %v580_v4 }
  0x9a   :  { %v120_v22 = vpop.xlane.xlu0 %119 }
  0x9b   :  { %v128_v23 = vmul.f32 %v963_v19, %v120_v22 }
  0x9d   :  { %v133_v24 = vperm.slane %v128_v23, %v132_v20  ;;  %v137_v25 = vperm.slane %v128_v23, %v136_v21  ;;  %v568_v21 = vor.u32 %v689_v15, %v565_v16 }
  0x9f   :  { %v140_v26 = vsub.f32 %v108_v5, %v133_v24  ;;  %v141_v27 = vsub.f32 %v109_v6, %v137_v25  ;;  %v584_v5 = vor.u32 %v693_v2, %v581_v3  ;;  %v571_v6 = vld [vmem:[#allocation7 + $0x10] sm:$0xf]  ;;  %v712_v24 = vld [vmem:[#allocation8 + $0x38] sm:$0xff] }
  0xa0   :  { %v572_v10 = vor.u32 %v692_v7, %v571_v6  ;;  %v720_v25 = vld [vmem:[#allocation8 + $0x78] sm:$0xff]  ;;  %468 = vmatpush.bf16.msra.mxu2 %v712_v24 }
  0xa1   :  { %v142_v28 = vmul.f32 %v140_v26, %v140_v26  ;;  %v143_v29 = vmul.f32 %v141_v27, %v141_v27  ;;  %312 = vmatpush.bf16.msra.mxu1 %v584_v5  ;;  %481 = vmatpush.bf16.msra.mxu3 %v720_v25 }
  0xa2   :  { %300 = vmatpush.bf16.msra.mxu0 %v572_v10 }
  0xa3   :  { %146 = vst [vmem:[#allocation1] ss:$4 sm:$0xff] %v142_v28  ;;  %v719_v28 = vld [vmem:[#allocation8 + $0x70] sm:$0xff] }
  0xa4   :  { %148 = vst [vmem:[#allocation1 + $0x1] ss:$4 sm:$0xff] %v143_v29 }
  0xa5   :  { %313 = vmatpush.bf16.msra.mxu1 %v576_v11  ;;  %482 = vmatpush.bf16.msra.mxu3 %v719_v28 }
  0xa6   :  { %301 = vmatpush.bf16.msra.mxu0 %v564_v18 }
  0xa9   :  { %314 = vmatpush.bf16.msra.mxu1 %v568_v21  ;;  %483 = vmatpush.bf16.msra.mxu3 %v718_v52 }
  0xab   :  { %v149_v30 = vld.sshfl [vmem:[#allocation1] sm:$0xff pattern:$0x73625140] }
  0xac   :  { %v151_v31 = vsel %vm117_vm0, %v149_v30, 0.0  ;;  %184 = vst [vmem:[#allocation1] ss:$4 sm:$0xff] %v140_v26 }
  0xad   :  { %186 = vst [vmem:[#allocation1 + $0x1] ss:$4 sm:$0xff] %v141_v27  ;;  %152 = vadd.xlane.f32.xlu0 %v151_v31  ;;  %v711_v27 = vld [vmem:[#allocation8 + $0x30] sm:$0xff]  ;;  %484 = vmatpush.bf16.msra.mxu3 %v717_v54 }
  0xae   :  { %469 = vmatpush.bf16.msra.mxu2 %v711_v27 }
  0xb1   :  { %485 = vmatpush.bf16.msra.mxu3 %v716_v56 }
  0xb2   :  { %470 = vmatpush.bf16.msra.mxu2 %v710_v51 }
  0xb4   :  { %v187_v41 = vld.sshfl [vmem:[#allocation1] sm:$0xff pattern:$0x73625140] }
  0xb5   :  { %v189_v45 = vmul.f32 %v187_v41, %v93_v40  ;;  %486 = vmatpush.bf16.msra.mxu3 %v715_v58 }
  0xb6   :  { %471 = vmatpush.bf16.msra.mxu2 %v709_v53 }
  0xb9   :  { %487 = vmatpush.bf16.msra.mxu3 %v714_v60 }
  0xba   :  { %472 = vmatpush.bf16.msra.mxu2 %v708_v55 }
  0xbd   :  { %488 = vmatpush.bf16.msra.mxu3 %v713_v62 }
  0xbe   :  { %473 = vmatpush.bf16.msra.mxu2 %v707_v57 }
  0xc2   :  { %474 = vmatpush.bf16.msra.mxu2 %v706_v59 }
 0x120   :  { %v153_v61 = vpop.xlane.xlu0 %152 }
 0x121   :  { %v154_v1 = vmul.f32 0.007874016, %v153_v61  ;;  %v705_v61 = vld [vmem:[#allocation8] sm:$0xff] }
 0x122   :  { %475 = vmatpush.bf16.msra.mxu2 %v705_v61  ;;  %v98_v61 = vld [vmem:[#allocation10 + $0x4] ss:$0 sm:$0xff] }
 0x123   :  { %738 = vrsqrt.f32 %v154_v1  ;;  %vm162_vm2 = vcmp.eq.f32.partialorder %v154_v1, inf  ;;  %v165_v30 = vand.u32 2147483648, %v154_v1  ;;  %vm164_vm3 = vcmp.eq.f32.partialorder %v154_v1, 0.0 }
 0x129   :  { %v739_v14 = vpop.eup %738 }
 0x12a   :  { %v156_v17 = vmul.f32 %v739_v14, %v154_v1 }
 0x12c   :  { %v157_v20 = vmul.f32 %v739_v14, %v156_v17 }
 0x12e   :  { %v158_v22 = vmul.f32 0.5, %v157_v20 }
 0x130   :  { %v159_v23 = vsub.f32 1.5, %v158_v22 }
 0x132   :  { %v160_v26 = vmul.f32 %v739_v14, %v159_v23 }
 0x134   :  { %v161_v29 = vmul.f32 %v160_v26, %v154_v1 }
 0x136   :  { %v163_v31 = vsel %vm162_vm2, %v154_v1, %v161_v29  ;;  %v211_v1 = vperm.slane %v96_v63, 1  ;;  %v97_v29 = vld [vmem:[#allocation10 + $0x3] ss:$0 sm:$0xff] }
 0x137   :  { %v166_v32 = vsel %vm164_vm3, %v165_v30, %v163_v31 }
 0x138   :  { %v167_v33 = vadd.f32 1e-06, %v166_v32 }
 0x13a   :  { %740 = vrcp.f32 %v167_v33  ;;  %v179_v37 = vand.u32 2147483648, %v167_v33  ;;  %v177_v39 = vand.u32 2147483647, %v167_v33  ;;  %vm173_vm5 = vweird.f32 %v167_v33 }
 0x13c   :  { %v180_v43 = vor.u32 1.1754944e-38, %v179_v37  ;;  %vm178_vm7 = vcmp.eq.f32.partialorder %v177_v39, 8.507059e+37 }
 0x140   :  { %v741_v34 = vpop.eup %740 }
 0x141   :  { %v169_v35 = vmul.f32 %v741_v34, %v167_v33  ;;  %vm174_vm4 = vweird.f32 %v741_v34 }
 0x142   :  { %vm175_vm6 = vmor %vm173_vm5, %vm174_vm4 }
 0x143   :  { %v170_v36 = vsub.f32 1.0, %v169_v35 }
 0x145   :  { %v171_v38 = vmul.f32 %v741_v34, %v170_v36 }
 0x147   :  { %v172_v42 = vadd.f32 %v741_v34, %v171_v38 }
 0x149   :  { %v176_v44 = vsel %vm175_vm6, %v741_v34, %v172_v42 }
 0x14a   :  { %v181_v47 = vsel %vm178_vm7, %v180_v43, %v176_v44 }
 0x14b   :  { %v190_v48 = vmul.f32 %v189_v45, %v181_v47 }
 0x14d   :  { %v967_v49 = vadd.f32 %v190_v48, %v94_v46 }
 0x14f   :  { %v192_v50 = vpack.c.bf16 %v967_v49, %v967_v49 }
 0x151   :  { %302 = vmatmul.bf16.vlgmr.msra.gmra.mxu0 %v192_v50  ;;  %315 = vmatmul.bf16.vlgmr.msra.gmra.mxu1 %v192_v50 }
 0x1ce   :  { %v303_v2 = vpop.f32.mrf.mxu0  ;;  %v316_v3 = vpop.f32.mrf.mxu1 }
 0x1cf   :  { %v304_v4 = vadd.f32 %v303_v2, %v210_v0  ;;  %v317_v5 = vadd.f32 %v316_v3, %v211_v1  ;;  %v99_v2 = vld [vmem:[#allocation10 + $0x5] ss:$0 sm:$0xff] }
 0x1d1   :  { %v322_v6 = vmul.f32 0.044715, %v304_v4  ;;  %v323_v7 = vmul.f32 0.044715, %v317_v5  ;;  %v320_v21 = vmul.f32 0.5, %v304_v4  ;;  %v321_v23 = vmul.f32 0.5, %v317_v5 }
 0x1d3   :  { %v324_v8 = vmul.f32 %v322_v6, %v304_v4  ;;  %v325_v9 = vmul.f32 %v323_v7, %v317_v5 }
 0x1d5   :  { %v326_v10 = vmul.f32 %v324_v8, %v304_v4  ;;  %v327_v11 = vmul.f32 %v325_v9, %v317_v5 }
 0x1d6   :  { %v305_v12 = vpop.f32.mrf.mxu0  ;;  %v318_v13 = vpop.f32.mrf.mxu1 }
 0x1d7   :  { %v328_v14 = vadd.f32 %v326_v10, %v304_v4  ;;  %v329_v15 = vadd.f32 %v327_v11, %v317_v5 }
 0x1d9   :  { %v330_v16 = vmul.f32 0.7978846, %v328_v14  ;;  %v331_v17 = vmul.f32 0.7978846, %v329_v15 }
 0x1db   :  { %742 = vtanh.f32 %v330_v16 }
 0x1dc   :  { %744 = vtanh.f32 %v331_v17 }
 0x1e1   :  { %v743_v18 = vpop.eup %742 }
 0x1e2   :  { %v745_v20 = vpop.eup %744  ;;  %v334_v22 = vadd.f32 1.0, %v743_v18 }
 0x1e3   :  { %v335_v24 = vadd.f32 1.0, %v745_v20 }
 0x1e4   :  { %v336_v25 = vmul.f32 %v334_v22, %v320_v21 }
 0x1e5   :  { %v337_v26 = vmul.f32 %v335_v24, %v321_v23 }
 0x1e6   :  { %v338_v27 = vpack.c.bf16 %v336_v25, %v336_v25 }
 0x1e7   :  { %v339_v28 = vpack.c.bf16 %v337_v26, %v337_v26 }
 0x1e8   :  { %476 = vmatmul.bf16.vlgmr.msra.gmra.mxu2 %v338_v27 }
 0x1e9   :  { %489 = vmatmul.bf16.vlgmr.msra.gmra.mxu3 %v339_v28 }
 0x26b   :  { %v477_v30 = vpop.f32.mrf.mxu2 }
 0x26c   :  { %v478_v31 = vadd.f32 %v477_v30, %v97_v29  ;;  %v490_v32 = vpop.f32.mrf.mxu3 }
 0x26e   :  { %v491_v33 = vadd.f32 %v490_v32, %v478_v31 }
 0x270   :  { %v494_v34 = vadd.f32 %v491_v33, %v967_v49 }
 0x272   :  { %v495_v35 = vsel %vm117_vm0, %v494_v34, 0.0 }
 0x273   :  { %v479_v36 = vpop.f32.mrf.mxu2  ;;  %496 = vadd.xlane.f32.xlu1 %v495_v35 }
 0x274   :  { %v492_v37 = vpop.f32.mrf.mxu3 }
 0x2e6   :  { %v497_v38 = vpop.xlane.xlu1 %496 }
 0x2e7   :  { %v498_v39 = vmul.f32 %v497_v38, %v963_v19 }
 0x2e9   :  { %v499_v40 = vsub.f32 %v494_v34, %v498_v39 }
 0x2eb   :  { %v500_v41 = vmul.f32 %v499_v40, %v499_v40  ;;  %v532_v0 = vmul.f32 %v499_v40, %v98_v61 }
 0x2ed   :  { %v501_v42 = vsel %vm117_vm0, %v500_v41, 0.0 }
 0x2ee   :  { %502 = vadd.xlane.f32.xlu1 %v501_v42 }
 0x361   :  { %v503_v43 = vpop.xlane.xlu1 %502 }
 0x362   :  { %v504_v44 = vmul.f32 0.007874016, %v503_v43 }
 0x364   :  { %746 = vrsqrt.f32 %v504_v44  ;;  %vm512_vm8 = vcmp.eq.f32.partialorder %v504_v44, inf  ;;  %v515_v52 = vand.u32 2147483648, %v504_v44  ;;  %vm514_vm9 = vcmp.eq.f32.partialorder %v504_v44, 0.0 }
 0x36a   :  { %v747_v45 = vpop.eup %746 }
 0x36b   :  { %v506_v46 = vmul.f32 %v747_v45, %v504_v44 }
 0x36d   :  { %v507_v47 = vmul.f32 %v747_v45, %v506_v46 }
 0x36f   :  { %v508_v48 = vmul.f32 0.5, %v507_v47 }
 0x371   :  { %v509_v49 = vsub.f32 1.5, %v508_v48 }
 0x373   :  { %v510_v50 = vmul.f32 %v747_v45, %v509_v49 }
 0x375   :  { %v511_v51 = vmul.f32 %v510_v50, %v504_v44 }
 0x377   :  { %v513_v53 = vsel %vm512_vm8, %v504_v44, %v511_v51 }
 0x378   :  { %v516_v19 = vsel %vm514_vm9, %v515_v52, %v513_v53 }
 0x379   :  { %v517_v54 = vadd.f32 1e-06, %v516_v19 }
 0x37b   :  { %748 = vrcp.f32 %v517_v54  ;;  %v529_v58 = vand.u32 2147483648, %v517_v54  ;;  %v527_v60 = vand.u32 2147483647, %v517_v54  ;;  %vm523_vm11 = vweird.f32 %v517_v54 }
 0x37d   :  { %v530_v63 = vor.u32 1.1754944e-38, %v529_v58  ;;  %vm528_vm13 = vcmp.eq.f32.partialorder %v527_v60, 8.507059e+37 }
 0x381   :  { %v749_v55 = vpop.eup %748 }
 0x382   :  { %v519_v56 = vmul.f32 %v749_v55, %v517_v54  ;;  %vm524_vm10 = vweird.f32 %v749_v55 }
 0x383   :  { %vm525_vm12 = vmor %vm523_vm11, %vm524_vm10 }
 0x384   :  { %v520_v57 = vsub.f32 1.0, %v519_v56 }
 0x386   :  { %v521_v59 = vmul.f32 %v749_v55, %v520_v57 }
 0x388   :  { %v522_v62 = vadd.f32 %v749_v55, %v521_v59 }
 0x38a   :  { %v526_v1 = vsel %vm525_vm12, %v749_v55, %v522_v62 }
 0x38b   :  { %v531_v3 = vsel %vm528_vm13, %v530_v63, %v526_v1 }
 0x38c   :  { %v533_v4 = vmul.f32 %v532_v0, %v531_v3 }
 0x38e   :  { %v534_v5 = vadd.f32 %v533_v4, %v99_v2 }
 0x390   :  { %v536_v6 = vrot.slane %v534_v5, 2  ;;  %538 = vst [vmem:[#allocation11] sm:$0x3] %v534_v5 }
 0x392   :  { %539 = vst [vmem:[#allocation11 + $0x2] sm:$0x3] %v536_v6 }
 0x393   :  { %552 = dma.vmem_to_hbm [thread:$0]  %s545_s4, 64, %s547_s21, [#allocation4], %s915_s22, %s915_s22, %s916_s23  }
 0x394   :  { %900 = dma.done.wait [#allocation4], 64  }
 0x395   :  { %901 = vsyncadd [#allocation4], 4294967232 }
 0x396   :  { %557 = vsyncpa [#allocation3], 1 }
 0x397   :  { %558 = vsyncpa [#allocation6], 1 }
 0x398   :  { %559 = vsyncpa [#allocation9], 1 }
 0x399   :  { %560 = vsyncpa [#allocation4], 1 }

</bundles_post_ra>
